<compile_context>
chip_gen: v7x
topology: tpu7x:2x2x1
jax: 0.10.0
libtpu: 0.0.40
codegen_flags: <defaults>
</compile_context>

<pallas_src>
import functools

import numpy as np
import jax
import jax.numpy as jnp
from jax.experimental import pallas as pl
from jax.experimental.pallas import tpu as pltpu


_FD_KERNELS = {
    "2": (np.array([1.0, -2.0, 1.0]), 0),
    "4": (np.array([-1 / 12, 4 / 3, -5 / 2, 4 / 3, -1 / 12]), 1),
    "6": (np.array([1 / 90, -3 / 20, 3 / 2, -49 / 18, 3 / 2, -3 / 20, 1 / 90]), 2),
    "8": (np.array([-1 / 560, 8 / 315, -1 / 5, 8 / 5, -205 / 72, 8 / 5, -1 / 5,
                    8 / 315, -1 / 560]), 3),
}


@functools.lru_cache(maxsize=None)
def _build_operator_matrices(H, W, kernel_name="6"):
    """R (H,H), C (W,W) such that R @ x @ C == F.pad(Conv2d_pad1(x), pad).

    Cached: the O(H^2 + W^2) host-side construction runs once per shape.
    """
    k, pad = _FD_KERNELS[kernel_name]
    k = np.asarray(k, dtype=np.float32)          # matches .float() in torch
    n = len(k)
    half = n // 2
    R = np.zeros((H, H), dtype=np.float32)
    for p in range(pad, H - pad):
        for u in range(n):
            r = p - half + u
            if 0 <= r < H:
                R[p, r] = 1.0
    Cm = np.zeros((W, W), dtype=np.float32)
    for q in range(pad, W - pad):
        for v in range(n):
            c = q - half + v
            if 0 <= c < W:
                Cm[c, q] = k[v]
    return R, Cm


def _helmholtz_kernel(p_ref, t_ref, eps_ref, sig_ref, r2_ref, c_ref, out_ref, *,
                      M, B, C, H, W, c2, norm):
    omega = 42.0
    mu0 = 1.0e-4

    # difference field: stencil is linear, apply it once to (pred - target)
    d = p_ref[...] - t_ref[...]                                   # (M, H, W)

    # ---- separable banded operator: Dlap = (2R) @ d @ C per map ----------
    # column pass: one lane/sublane-friendly (M*H, W) @ (W, W) MXU matmul
    # (precision: keep f32 operands -- see header comment)
    y = jnp.dot(d.reshape(M * H, W), c_ref[...],
                preferred_element_type=jnp.float32).reshape(M, H, W)
    # row pass: (M)-batched (H,H) @ (H,W) matmul (2.0 folded into R2)
    r2b = jnp.broadcast_to(r2_ref[...], (M, H, H))
    dlap = jnp.einsum("mpr,mrw->mpw", r2b, y,
                      preferred_element_type=jnp.float32)         # (M, H, W)

    # ---- per-pixel wave-number batch sums (dx^2 folded into constants) ---
    twn_r = eps_ref[...] * jnp.float32(mu0 * omega * omega * c2)  # (B, H, W)
    twn_i = sig_ref[...] * jnp.float32(-omega * c2)
    s1_r = jnp.sum(twn_r, axis=0)                                 # (H, W)
    s1_i = jnp.sum(twn_i, axis=0)
    s2_r = jnp.sum(twn_r * twn_r, axis=0)
    s2_i = jnp.sum(twn_i * twn_i, axis=0)

    # channel parity per map (map m -> channel m % C; even channel -> real)
    row = jax.lax.broadcasted_iota(jnp.int32, (M, 1), 0)
    even = (((row % C) % 2) == 0).astype(jnp.float32).reshape(M, 1, 1)

    # parity-split per-pixel partial sums over the maps
    pd = dlap * d
    dd = d * d
    a_all = jnp.sum(pd, axis=0)                                   # (H, W)
    a_e = jnp.sum(pd * even, axis=0)
    a_o = a_all - a_e
    q_all = jnp.sum(dd, axis=0)
    q_e = jnp.sum(dd * even, axis=0)
    q_o = q_all - q_e

    # sum_{m,b} (Dlap + t_b*D)^2 = B*sum Dlap^2
    #                              + 2*sum_px(S1 * sum_m Dlap*D)
    #                              +   sum_px(S2 * sum_m D*D), split by parity
    total = (jnp.float32(B) * jnp.sum(dlap * dlap)
             + 2.0 * (jnp.sum(a_e * s1_r) + jnp.sum(a_o * s1_i))
             + jnp.sum(q_e * s2_r) + jnp.sum(q_o * s2_i))

    # scalar loss -> (1,1) SMEM output (no padded VMEM tile / masked store)
    out_ref[0, 0] = total * jnp.float32(norm)


@functools.partial(jax.jit, static_argnames=("dx", "kernel"))
def _helmholtz_loss_jit(pred, target, x_input, *, dx, kernel):
    B, C, H, W = pred.shape
    M = B * C

    R_np, C_np = _build_operator_matrices(H, W, kernel)
    r2 = jnp.asarray(2.0 * R_np, dtype=jnp.float32)   # xx + yy == 2*conv folded
    cm = jnp.asarray(C_np, dtype=jnp.float32)

    # layout plumbing only (no compute hoisted into the wrapper)
    pred_f = pred.reshape(M, H, W).astype(jnp.float32)
    tgt_f = target.reshape(M, H, W).astype(jnp.float32)
    eps = x_input[:, 0].astype(jnp.float32)            # (B, H, W)
    sig = x_input[:, 1].astype(jnp.float32)

    body = functools.partial(
        _helmholtz_kernel,
        M=M, B=B, C=C, H=H, W=W,
        c2=float(dx) * float(dx),
        norm=1.0 / float(C * B * B * H * W),
    )

    out = pl.pallas_call(
        body,
        out_shape=jax.ShapeDtypeStruct((1, 1), jnp.float32),
        grid=(1,),
        in_specs=[
            pl.BlockSpec((M, H, W), lambda i: (0, 0, 0)),   # pred maps
            pl.BlockSpec((M, H, W), lambda i: (0, 0, 0)),   # target maps
            pl.BlockSpec((B, H, W), lambda i: (0, 0, 0)),   # epsilon
            pl.BlockSpec((B, H, W), lambda i: (0, 0, 0)),   # sigma
            pl.BlockSpec((H, H), lambda i: (0, 0)),         # 2*R (row band)
            pl.BlockSpec((W, W), lambda i: (0, 0)),         # C   (col band)
        ],
        out_specs=pl.BlockSpec(memory_space=pltpu.MemorySpace.SMEM),
        compiler_params=pltpu.CompilerParams(dimension_semantics=("arbitrary",)),
    )(pred_f, tgt_f, eps, sig, r2, cm)
    return out[0, 0]


def helmholtz_loss_epsilon_sigma(pred, target, x_input, dx=1 / 256, kernel="6"):
    """Jitted public entry point (operator build/upload happens once per shape)."""
    return _helmholtz_loss_jit(pred, target, x_input, dx=float(dx), kernel=str(kernel))


def _reference_loss(pred, target, x_input, dx=1 / 256, kernel="6"):
    """Pure-JAX reference mirroring the PyTorch forward (incl. cross-batch broadcast)."""
    B, C, H, W = pred.shape
    Rn, Cn = _build_operator_matrices(H, W, kernel)
    R, Cm = jnp.asarray(Rn), jnp.asarray(Cn)
    omega, mu0 = 42.0, 1.0e-4
    eps = x_input[:, 0]
    sig = x_input[:, 1]
    twn_real = eps * mu0 * omega ** 2
    twn_imag = -sig * omega
    loss = jnp.float32(0.0)
    for i in range(C):
        p = pred[:, i]
        t = target[:, i]
        lap_p = 2.0 * jnp.einsum("hr,arc,cw->ahw", R, p, Cm)
        lap_t = 2.0 * jnp.einsum("hr,arc,cw->ahw", R, t, Cm)
        twn = twn_real if i % 2 == 0 else twn_imag
        hp = lap_p[:, None] + (dx ** 2) * twn[None, :] * p[:, None]   # (B, B, H, W)
        ht = lap_t[:, None] + (dx ** 2) * twn[None, :] * t[:, None]
        loss = loss + (1.0 / C) * jnp.mean((hp - ht) ** 2)
    return loss


if __name__ == "__main__":
    B, C, H, W = 2, 4, 16, 16
    key = jax.random.PRNGKey(0)
    k1, k2, k3 = jax.random.split(key, 3)
    pred = jax.random.normal(k1, (B, C, H, W), dtype=jnp.float32)
    target = jax.random.normal(k2, (B, C, H, W), dtype=jnp.float32)
    x_input = jax.random.uniform(k3, (B, 2, H, W), dtype=jnp.float32)

    loss = jax.block_until_ready(helmholtz_loss_epsilon_sigma(pred, target, x_input))
    ref = jax.block_until_ready(_reference_loss(pred, target, x_input))

    assert np.allclose(np.asarray(loss), np.asarray(ref), rtol=1e-4, atol=1e-5), (
        float(loss), float(ref))
    print("KERNEL_OK")
</pallas_src>

<mosaic_0001>
module attributes {stable_mosaic.version = 11 : i64} {
  func.func @_helmholtz_kernel(%arg0: i32, %arg1: memref<8x16x16xf32, #tpu.memory_space<vmem>>, %arg2: memref<8x16x16xf32, #tpu.memory_space<vmem>>, %arg3: memref<2x16x16xf32, #tpu.memory_space<vmem>>, %arg4: memref<2x16x16xf32, #tpu.memory_space<vmem>>, %arg5: memref<16x16xf32, #tpu.memory_space<vmem>>, %arg6: memref<16x16xf32, #tpu.memory_space<vmem>>, %arg7: memref<1x1xf32, #tpu.memory_space<smem>>) attributes {dimension_semantics = [#tpu.dimension_semantics<arbitrary>], iteration_bounds = array<i64: 1>, scalar_prefetch = 0 : i64, scratch_operands = 0 : i64, tpu.core_type = #tpu.core_type<tc>, window_params = [{pipeline_mode = #tpu.pipeline_mode<synchronous>, transform_indices = @transform_0, window_bounds = array<i64: 8, 16, 16>}, {pipeline_mode = #tpu.pipeline_mode<synchronous>, transform_indices = @transform_1, window_bounds = array<i64: 8, 16, 16>}, {pipeline_mode = #tpu.pipeline_mode<synchronous>, transform_indices = @transform_2, window_bounds = array<i64: 2, 16, 16>}, {pipeline_mode = #tpu.pipeline_mode<synchronous>, transform_indices = @transform_3, window_bounds = array<i64: 2, 16, 16>}, {pipeline_mode = #tpu.pipeline_mode<synchronous>, transform_indices = @transform_4, window_bounds = array<i64: 16, 16>}, {pipeline_mode = #tpu.pipeline_mode<synchronous>, transform_indices = @transform_5, window_bounds = array<i64: 16, 16>}, {transform_indices = @transform_6, window_bounds = array<i64: 1, 1>}]} {
    %c0 = arith.constant 0 : index
    %c0_0 = arith.constant 0 : index
    %c0_1 = arith.constant 0 : index
    %0 = vector.load %arg1[%c0, %c0_0, %c0_1] : memref<8x16x16xf32, #tpu.memory_space<vmem>>, vector<8x16x16xf32>
    %c0_2 = arith.constant 0 : index
    %c0_3 = arith.constant 0 : index
    %c0_4 = arith.constant 0 : index
    %1 = vector.load %arg2[%c0_2, %c0_3, %c0_4] : memref<8x16x16xf32, #tpu.memory_space<vmem>>, vector<8x16x16xf32>
    %2 = arith.subf %0, %1 : vector<8x16x16xf32>
    %3 = vector.shape_cast %2 : vector<8x16x16xf32> to vector<128x16xf32>
    %c0_5 = arith.constant 0 : index
    %c0_6 = arith.constant 0 : index
    %4 = vector.load %arg6[%c0_5, %c0_6] : memref<16x16xf32, #tpu.memory_space<vmem>>, vector<16x16xf32>
    %cst = arith.constant dense<0.000000e+00> : vector<128x16xf32>
    %5 = tpu.matmul %3, %4, %cst {dimension_numbers = #tpu.dot_dimension_numbers<[1], [0], [0], [1], [0, 0, 1, 1], [], []>} : vector<128x16xf32>, vector<16x16xf32>, vector<128x16xf32> -> vector<128x16xf32>
    %6 = vector.shape_cast %5 : vector<128x16xf32> to vector<8x16x16xf32>
    %c0_7 = arith.constant 0 : index
    %c0_8 = arith.constant 0 : index
    %7 = vector.load %arg5[%c0_7, %c0_8] : memref<16x16xf32, #tpu.memory_space<vmem>>, vector<16x16xf32>
    %8 = vector.shape_cast %7 : vector<16x16xf32> to vector<1x16x16xf32>
    %9 = vector.broadcast %8 : vector<1x16x16xf32> to vector<8x16x16xf32>
    "tpu.trace_start"() <{level = 10 : i32, message = "mpr,mrw->mpw"}> : () -> ()
    %cst_9 = arith.constant dense<0.000000e+00> : vector<8x16x16xf32>
    %10 = tpu.matmul %9, %6, %cst_9 {dimension_numbers = #tpu.dot_dimension_numbers<[2], [1], [1], [2], [0, 0, 0, 1, 1, 2], [0], [0]>} : vector<8x16x16xf32>, vector<8x16x16xf32>, vector<8x16x16xf32> -> vector<8x16x16xf32>
    "tpu.trace_stop"() : () -> ()
    %c0_10 = arith.constant 0 : index
    %c0_11 = arith.constant 0 : index
    %c0_12 = arith.constant 0 : index
    %11 = vector.load %arg3[%c0_10, %c0_11, %c0_12] : memref<2x16x16xf32, #tpu.memory_space<vmem>>, vector<2x16x16xf32>
    %cst_13 = arith.constant 2.69165048E-6 : f32
    %12 = vector.broadcast %cst_13 : f32 to vector<2x16x16xf32>
    %13 = arith.mulf %11, %12 : vector<2x16x16xf32>
    %c0_14 = arith.constant 0 : index
    %c0_15 = arith.constant 0 : index
    %c0_16 = arith.constant 0 : index
    %14 = vector.load %arg4[%c0_14, %c0_15, %c0_16] : memref<2x16x16xf32, #tpu.memory_space<vmem>>, vector<2x16x16xf32>
    %cst_17 = arith.constant -6.4086914E-4 : f32
    %15 = vector.broadcast %cst_17 : f32 to vector<2x16x16xf32>
    %16 = arith.mulf %14, %15 : vector<2x16x16xf32>
    %cst_18 = arith.constant dense<0.000000e+00> : vector<16x16xf32>
    %17 = vector.multi_reduction <add>, %13, %cst_18 [0] : vector<2x16x16xf32> to vector<16x16xf32>
    %cst_19 = arith.constant dense<0.000000e+00> : vector<16x16xf32>
    %18 = vector.multi_reduction <add>, %16, %cst_19 [0] : vector<2x16x16xf32> to vector<16x16xf32>
    %19 = arith.mulf %13, %13 : vector<2x16x16xf32>
    %cst_20 = arith.constant dense<0.000000e+00> : vector<16x16xf32>
    %20 = vector.multi_reduction <add>, %19, %cst_20 [0] : vector<2x16x16xf32> to vector<16x16xf32>
    %21 = arith.mulf %16, %16 : vector<2x16x16xf32>
    %cst_21 = arith.constant dense<0.000000e+00> : vector<16x16xf32>
    %22 = vector.multi_reduction <add>, %21, %cst_21 [0] : vector<2x16x16xf32> to vector<16x16xf32>
    %23 = tpu.iota {dimensions = array<i32: 0>} : vector<8x1xi32>
    %c4_i32 = arith.constant 4 : i32
    %c0_i32 = arith.constant 0 : i32
    %24 = arith.cmpi eq, %c4_i32, %c0_i32 : i32
    %c1_i32 = arith.constant 1 : i32
    %25 = arith.select %24, %c1_i32, %c4_i32 : i32
    %26 = vector.broadcast %25 : i32 to vector<8x1xi32>
    %27 = arith.remsi %23, %26 : vector<8x1xi32>
    %c0_i32_22 = arith.constant 0 : i32
    %28 = vector.broadcast %c0_i32_22 : i32 to vector<8x1xi32>
    %29 = arith.cmpi ne, %27, %28 : vector<8x1xi32>
    %c0_i32_23 = arith.constant 0 : i32
    %30 = vector.broadcast %c0_i32_23 : i32 to vector<8x1xi32>
    %31 = arith.cmpi slt, %27, %30 : vector<8x1xi32>
    %c0_i32_24 = arith.constant 0 : i32
    %32 = arith.cmpi slt, %25, %c0_i32_24 : i32
    %33 = vector.broadcast %32 : i1 to vector<8x1xi1>
    %34 = vector.broadcast %33 : vector<8x1xi1> to vector<8x1xi1>
    %35 = arith.xori %31, %34 : vector<8x1xi1>
    %36 = arith.andi %35, %29 : vector<8x1xi1>
    %37 = vector.broadcast %25 : i32 to vector<8x1xi32>
    %38 = arith.addi %27, %37 : vector<8x1xi32>
    %39 = arith.select %36, %38, %27 : vector<8x1xi1>, vector<8x1xi32>
    %c2_i32 = arith.constant 2 : i32
    %c0_i32_25 = arith.constant 0 : i32
    %40 = arith.cmpi eq, %c2_i32, %c0_i32_25 : i32
    %c1_i32_26 = arith.constant 1 : i32
    %41 = arith.select %40, %c1_i32_26, %c2_i32 : i32
    %42 = vector.broadcast %41 : i32 to vector<8x1xi32>
    %43 = arith.remsi %39, %42 : vector<8x1xi32>
    %c0_i32_27 = arith.constant 0 : i32
    %44 = vector.broadcast %c0_i32_27 : i32 to vector<8x1xi32>
    %45 = arith.cmpi ne, %43, %44 : vector<8x1xi32>
    %c0_i32_28 = arith.constant 0 : i32
    %46 = vector.broadcast %c0_i32_28 : i32 to vector<8x1xi32>
    %47 = arith.cmpi slt, %43, %46 : vector<8x1xi32>
    %c0_i32_29 = arith.constant 0 : i32
    %48 = arith.cmpi slt, %41, %c0_i32_29 : i32
    %49 = vector.broadcast %48 : i1 to vector<8x1xi1>
    %50 = vector.broadcast %49 : vector<8x1xi1> to vector<8x1xi1>
    %51 = arith.xori %47, %50 : vector<8x1xi1>
    %52 = arith.andi %51, %45 : vector<8x1xi1>
    %53 = vector.broadcast %41 : i32 to vector<8x1xi32>
    %54 = arith.addi %43, %53 : vector<8x1xi32>
    %55 = arith.select %52, %54, %43 : vector<8x1xi1>, vector<8x1xi32>
    %c0_i32_30 = arith.constant 0 : i32
    %56 = vector.broadcast %c0_i32_30 : i32 to vector<8x1xi32>
    %57 = arith.cmpi eq, %55, %56 : vector<8x1xi32>
    %58 = arith.extui %57 : vector<8x1xi1> to vector<8x1xi32>
    %59 = arith.sitofp %58 : vector<8x1xi32> to vector<8x1xf32>
    %60 = vector.shape_cast %59 : vector<8x1xf32> to vector<8x1x1xf32>
    %61 = arith.mulf %10, %2 : vector<8x16x16xf32>
    %62 = arith.mulf %2, %2 : vector<8x16x16xf32>
    %cst_31 = arith.constant dense<0.000000e+00> : vector<16x16xf32>
    %63 = vector.multi_reduction <add>, %61, %cst_31 [0] : vector<8x16x16xf32> to vector<16x16xf32>
    %64 = vector.broadcast %60 : vector<8x1x1xf32> to vector<8x16x16xf32>
    %65 = arith.mulf %61, %64 : vector<8x16x16xf32>
    %cst_32 = arith.constant dense<0.000000e+00> : vector<16x16xf32>
    %66 = vector.multi_reduction <add>, %65, %cst_32 [0] : vector<8x16x16xf32> to vector<16x16xf32>
    %67 = arith.subf %63, %66 : vector<16x16xf32>
    %cst_33 = arith.constant dense<0.000000e+00> : vector<16x16xf32>
    %68 = vector.multi_reduction <add>, %62, %cst_33 [0] : vector<8x16x16xf32> to vector<16x16xf32>
    %69 = vector.broadcast %60 : vector<8x1x1xf32> to vector<8x16x16xf32>
    %70 = arith.mulf %62, %69 : vector<8x16x16xf32>
    %cst_34 = arith.constant dense<0.000000e+00> : vector<16x16xf32>
    %71 = vector.multi_reduction <add>, %70, %cst_34 [0] : vector<8x16x16xf32> to vector<16x16xf32>
    %72 = arith.subf %68, %71 : vector<16x16xf32>
    %73 = arith.mulf %10, %10 : vector<8x16x16xf32>
    %74 = vector.shape_cast %73 : vector<8x16x16xf32> to vector<1x8x16x16xf32>
    %cst_35 = arith.constant dense<0.000000e+00> : vector<1xf32>
    %75 = vector.multi_reduction <add>, %74, %cst_35 [1, 2, 3] : vector<1x8x16x16xf32> to vector<1xf32>
    %76 = vector.shape_cast %75 : vector<1xf32> to vector<1x1x1x1xf32>
    %77 = vector.extract %76[0, 0, 0, 0] : f32 from vector<1x1x1x1xf32>
    %cst_36 = arith.constant 2.000000e+00 : f32
    %78 = arith.mulf %cst_36, %77 : f32
    %79 = arith.mulf %66, %17 : vector<16x16xf32>
    %80 = vector.shape_cast %79 : vector<16x16xf32> to vector<1x16x16xf32>
    %cst_37 = arith.constant dense<0.000000e+00> : vector<1xf32>
    %81 = vector.multi_reduction <add>, %80, %cst_37 [1, 2] : vector<1x16x16xf32> to vector<1xf32>
    %82 = vector.shape_cast %81 : vector<1xf32> to vector<1x1x1xf32>
    %83 = vector.extract %82[0, 0, 0] : f32 from vector<1x1x1xf32>
    %84 = arith.mulf %67, %18 : vector<16x16xf32>
    %85 = vector.shape_cast %84 : vector<16x16xf32> to vector<1x16x16xf32>
    %cst_38 = arith.constant dense<0.000000e+00> : vector<1xf32>
    %86 = vector.multi_reduction <add>, %85, %cst_38 [1, 2] : vector<1x16x16xf32> to vector<1xf32>
    %87 = vector.shape_cast %86 : vector<1xf32> to vector<1x1x1xf32>
    %88 = vector.extract %87[0, 0, 0] : f32 from vector<1x1x1xf32>
    %89 = arith.addf %83, %88 : f32
    %cst_39 = arith.constant 2.000000e+00 : f32
    %90 = arith.mulf %cst_39, %89 : f32
    %91 = arith.addf %78, %90 : f32
    %92 = arith.mulf %71, %20 : vector<16x16xf32>
    %93 = vector.shape_cast %92 : vector<16x16xf32> to vector<1x16x16xf32>
    %cst_40 = arith.constant dense<0.000000e+00> : vector<1xf32>
    %94 = vector.multi_reduction <add>, %93, %cst_40 [1, 2] : vector<1x16x16xf32> to vector<1xf32>
    %95 = vector.shape_cast %94 : vector<1xf32> to vector<1x1x1xf32>
    %96 = vector.extract %95[0, 0, 0] : f32 from vector<1x1x1xf32>
    %97 = arith.addf %91, %96 : f32
    %98 = arith.mulf %72, %22 : vector<16x16xf32>
    %99 = vector.shape_cast %98 : vector<16x16xf32> to vector<1x16x16xf32>
    %cst_41 = arith.constant dense<0.000000e+00> : vector<1xf32>
    %100 = vector.multi_reduction <add>, %99, %cst_41 [1, 2] : vector<1x16x16xf32> to vector<1xf32>
    %101 = vector.shape_cast %100 : vector<1xf32> to vector<1x1x1xf32>
    %102 = vector.extract %101[0, 0, 0] : f32 from vector<1x1x1xf32>
    %103 = arith.addf %97, %102 : f32
    %cst_42 = arith.constant 2.44140625E-4 : f32
    %104 = arith.mulf %103, %cst_42 : f32
    %c0_43 = arith.constant 0 : index
    %c0_44 = arith.constant 0 : index
    %105 = memref.load %arg7[%c0_43, %c0_44] : memref<1x1xf32, #tpu.memory_space<smem>>
    memref.store %104, %arg7[%c0_43, %c0_44] : memref<1x1xf32, #tpu.memory_space<smem>>
    return
  }
  func.func @transform_0(%arg0: i32) -> (i32, i32, i32) {
    %c0_i32 = arith.constant 0 : i32
    %c0_i32_0 = arith.constant 0 : i32
    %c0_i32_1 = arith.constant 0 : i32
    %c0_i32_2 = arith.constant 0 : i32
    return %c0_i32, %c0_i32_0, %c0_i32_1 : i32, i32, i32
  }
  func.func @transform_1(%arg0: i32) -> (i32, i32, i32) {
    %c0_i32 = arith.constant 0 : i32
    %c0_i32_0 = arith.constant 0 : i32
    %c0_i32_1 = arith.constant 0 : i32
    %c0_i32_2 = arith.constant 0 : i32
    return %c0_i32, %c0_i32_0, %c0_i32_1 : i32, i32, i32
  }
  func.func @transform_2(%arg0: i32) -> (i32, i32, i32) {
    %c0_i32 = arith.constant 0 : i32
    %c0_i32_0 = arith.constant 0 : i32
    %c0_i32_1 = arith.constant 0 : i32
    %c0_i32_2 = arith.constant 0 : i32
    return %c0_i32, %c0_i32_0, %c0_i32_1 : i32, i32, i32
  }
  func.func @transform_3(%arg0: i32) -> (i32, i32, i32) {
    %c0_i32 = arith.constant 0 : i32
    %c0_i32_0 = arith.constant 0 : i32
    %c0_i32_1 = arith.constant 0 : i32
    %c0_i32_2 = arith.constant 0 : i32
    return %c0_i32, %c0_i32_0, %c0_i32_1 : i32, i32, i32
  }
  func.func @transform_4(%arg0: i32) -> (i32, i32) {
    %c0_i32 = arith.constant 0 : i32
    %c0_i32_0 = arith.constant 0 : i32
    %c0_i32_1 = arith.constant 0 : i32
    return %c0_i32, %c0_i32_0 : i32, i32
  }
  func.func @transform_5(%arg0: i32) -> (i32, i32) {
    %c0_i32 = arith.constant 0 : i32
    %c0_i32_0 = arith.constant 0 : i32
    %c0_i32_1 = arith.constant 0 : i32
    return %c0_i32, %c0_i32_0 : i32, i32
  }
  func.func @transform_6(%arg0: i32) -> (i32, i32) {
    %c0_i32 = arith.constant 0 : i32
    %c0_i32_0 = arith.constant 0 : i32
    %c0_i32_1 = arith.constant 0 : i32
    return %c0_i32, %c0_i32_0 : i32, i32
  }
}

</mosaic_0001>

<bundles_post_ra>
// kernel: _helmholtz_loss_jit.1
= control target key start
LH: loop header
LB: loop body
LE: loop exit
PB: predicated region body
PF: predicated region fallthrough
CT: control target
= control target key end

     0   :  { %11 = vsyncpa [#allocation3], 0  ;;  %s2133_s0 = inlined_call_operand.vmem [shape: f32[8,16,16], index: 0, kind: input, shape index: {}]   ;;  %s2134_s1 = inlined_call_operand.hbm [shape: f32[8,16,16], index: 1, kind: input, shape index: {}]   ;;  %s2135_s2 = inlined_call_operand.vmem [shape: f32[2,16,16], index: 2, kind: input, shape index: {}]   ;;  %s2136_s3 = inlined_call_operand.vmem [shape: f32[2,16,16], index: 3, kind: input, shape index: {}]   ;;  %s2137_s4 = inlined_call_operand.hbm [shape: f32[16,16], index: 4, kind: input, shape index: {}]   ;;  %s2138_s5 = inlined_call_operand.vmem [shape: f32[16,16], index: 5, kind: input, shape index: {}]   ;;  %s2139_s6 = inlined_call_operand.hbm [shape: f32[1,1], index: 6, kind: output, shape index: {}]  }
   0x1   :  { %12 = vsyncpa [#allocation6], 0 }
   0x2   :  { %13 = vsyncpa [#allocation4], 0  ;;  %s1625_s21 = smov [#allocation2]   ;;  %s1565_s25 = scalar_lea.hbm %s2134_s1, 2048 }
   0x3   :  { %s21_s22 = sshll.u32 %s1625_s21, 4  ;;  %p1566_p0 = scmp.ne.s32.totalorder %s2134_s1, %s1565_s25  ;;  %s22_s22 = int_to_ptr.vmem [resolvable:$true] %s21_s22 }
   0x4   :  { %p1569_p1 = scmp.lt.u32.totalorder %s1565_s25, %s2134_s1 }
   0x6   :  { %p1571_p2 = pnand %p1569_p1, %p1566_p0 }
   0x8   :  { %1574 = shalt.err (!%p1571_p2)
}
   0x9   :  { %s1575_s30 = scalar_lea.vmem %s22_s22, 2048  ;;  %p1580_p4 = scmp.lt.s32.totalorder %s22_s22, %s22_s22 }
   0xa   :  { %p1576_p3 = scmp.ne.s32.totalorder %s22_s22, %s1575_s30  ;;  %p1581_p5 = scmp.lt.s32.totalorder %s1575_s30, %s1575_s30 }
   0xc   :  { %p1582_p6 = por %p1581_p5, %p1580_p4 }
   0xe   :  { %p1583_p7 = pnand %p1582_p6, %p1576_p3 }
  0x10   :  { %1586 = shalt.err (!%p1583_p7)
}
  0x11   :  { %s1626_s7 = smov 128   ;;  %s1627_s8 = smov 8  }
  0x12   :  { %27 = dma.hbm_to_vmem [thread:$0]  %s2134_s1, 2048, %s22_s22, [#allocation3], %s1626_s7, %s1626_s7, %s1627_s8  }
  0x13   :  { %s1628_s11 = smov [#allocation5]   ;;  %s1587_s15 = scalar_lea.hbm %s2137_s4, 256 }
  0x14   :  { %s37_s12 = sshll.u32 %s1628_s11, 4  ;;  %p1588_p8 = scmp.ne.s32.totalorder %s2137_s4, %s1587_s15  ;;  %s38_s12 = int_to_ptr.vmem [resolvable:$true] %s37_s12 }
  0x15   :  { %p1591_p9 = scmp.lt.u32.totalorder %s1587_s15, %s2137_s4 }
  0x17   :  { %p1593_p10 = pnand %p1591_p9, %p1588_p8 }
  0x19   :  { %1596 = shalt.err (!%p1593_p10)
}
  0x1a   :  { %s1597_s20 = scalar_lea.vmem %s38_s12, 256  ;;  %p1602_p12 = scmp.lt.s32.totalorder %s38_s12, %s38_s12 }
  0x1b   :  { %p1598_p11 = scmp.ne.s32.totalorder %s38_s12, %s1597_s20  ;;  %p1603_p13 = scmp.lt.s32.totalorder %s1597_s20, %s1597_s20 }
  0x1d   :  { %p1604_p0 = por %p1603_p13, %p1602_p12 }
  0x1f   :  { %p1605_p1 = pnand %p1604_p0, %p1598_p11 }
  0x21   :  { %1608 = shalt.err (!%p1605_p1)
}
  0x22   :  { %43 = dma.hbm_to_vmem [thread:$0]  %s2137_s4, 256, %s38_s12, [#allocation6], %s1626_s7, %s1626_s7, %s1627_s8  }
  0x23   :  { %1619 = dma.done.wait [#allocation3], 2048  }
  0x24   :  { %1620 = vsyncadd [#allocation3], 4294965248 }
  0x25   :  { %1621 = dma.done.wait [#allocation6], 256  }
  0x26   :  { %1622 = vsyncadd [#allocation6], 4294967040  ;;  %v100_v0 = vld [vmem:[%s2138_s5] sm:$0xff]  ;;  %v101_v1 = vld [vmem:[%s2138_s5 + $0x8] sm:$0xff]  ;;  %vm102_vm0 = vcmask 130048  }
  0x27   :  { %v52_v2 = vld [vmem:[%s2133_s0] sm:$0xff]  ;;  %v1513_v3 = vpack.c.bf16 %v101_v1, %v100_v0  ;;  %v53_v5 = vld [vmem:[%s2133_s0 + $0x8] sm:$0xff]  ;;  %v54_v8 = vld [vmem:[%s2133_s0 + $0x10] sm:$0xff] }
  0x28   :  { %v68_v4 = vld [vmem:[#allocation2] sm:$0xff]  ;;  %v69_v6 = vld [vmem:[#allocation2 + $0x8] sm:$0xff]  ;;  %v70_v9 = vld [vmem:[#allocation2 + $0x10] sm:$0xff] }
  0x29   :  { %v1702_v7 = vsub.f32 %v52_v2, %v68_v4  ;;  %1514 = vmatprep.subr.bf16.mxu0 %v1513_v3  ;;  %v1707_v10 = vsub.f32 %v53_v5, %v69_v6  ;;  %v1711_v11 = vsub.f32 %v54_v8, %v70_v9  ;;  %v55_v12 = vld [vmem:[%s2133_s0 + $0x18] sm:$0xff]  ;;  %v56_v14 = vld [vmem:[%s2133_s0 + $0x20] sm:$0xff]  ;;  %v57_v18 = vld [vmem:[%s2133_s0 + $0x28] sm:$0xff] }
  0x2a   :  { %1516 = vmatpush3.bf16.msra.mxu0 %v1513_v3  ;;  %v71_v13 = vld [vmem:[#allocation2 + $0x18] sm:$0xff]  ;;  %v72_v15 = vld [vmem:[#allocation2 + $0x20] sm:$0xff]  ;;  %v73_v19 = vld [vmem:[#allocation2 + $0x28] sm:$0xff] }
  0x2b   :  { %1433 = vmatprep.mubr.msk.f32.mxu0 %vm102_vm0, %v1702_v7  ;;  %v1721_v16 = vsub.f32 %v55_v12, %v71_v13  ;;  %v1725_v17 = vsub.f32 %v56_v14, %v72_v15  ;;  %v58_v20 = vld [vmem:[%s2133_s0 + $0x30] sm:$0xff]  ;;  %v1735_v22 = vsub.f32 %v57_v18, %v73_v19  ;;  %v59_v24 = vld [vmem:[%s2133_s0 + $0x38] sm:$0xff]  ;;  %v60_v26 = vld [vmem:[%s2133_s0 + $0x40] sm:$0xff]  ;;  %v952_v18 = vlaneseq }
  0x2c   :  { %v74_v21 = vld [vmem:[#allocation2 + $0x30] sm:$0xff]  ;;  %v75_v25 = vld [vmem:[#allocation2 + $0x38] sm:$0xff]  ;;  %v76_v27 = vld [vmem:[#allocation2 + $0x40] sm:$0xff] }
  0x2d   :  { %1434 = vmatmul.mubr.msk.f32.vlgmr.msra.gmra.mrb[0].mxu0 %vm102_vm0, %v1707_v10  ;;  %v1739_v23 = vsub.f32 %v58_v20, %v74_v21  ;;  %v1749_v28 = vsub.f32 %v59_v24, %v75_v25  ;;  %v1753_v29 = vsub.f32 %v60_v26, %v76_v27  ;;  %v61_v30 = vld [vmem:[%s2133_s0 + $0x48] sm:$0xff]  ;;  %v62_v32 = vld [vmem:[%s2133_s0 + $0x50] sm:$0xff]  ;;  %v63_v36 = vld [vmem:[%s2133_s0 + $0x58] sm:$0xff]  ;;  %v1824_v19 = vshrl.u32 %v952_v18, 7 }
  0x2e   :  { %1436 = vmatprep.mubr.msk.f32.mxu0 %vm102_vm0, %v1711_v11  ;;  %v77_v31 = vld [vmem:[#allocation2 + $0x48] sm:$0xff]  ;;  %v78_v33 = vld [vmem:[#allocation2 + $0x50] sm:$0xff]  ;;  %v79_v37 = vld [vmem:[#allocation2 + $0x58] sm:$0xff]  ;;  %v1629_v25 = vmov 0.0   ;;  %v1038_v27 = vmul.f32 %v1702_v7, %v1702_v7 }
  0x2f   :  { %v1763_v34 = vsub.f32 %v61_v30, %v77_v31  ;;  %v1767_v35 = vsub.f32 %v62_v32, %v78_v33  ;;  %v64_v38 = vld [vmem:[%s2133_s0 + $0x60] sm:$0xff]  ;;  %v1777_v40 = vsub.f32 %v63_v36, %v79_v37  ;;  %v65_v42 = vld [vmem:[%s2133_s0 + $0x68] sm:$0xff]  ;;  %v66_v44 = vld [vmem:[%s2133_s0 + $0x70] sm:$0xff]  ;;  %v958_v20 = vand.u32 3, %v1824_v19 }
  0x30   :  { %v80_v39 = vld [vmem:[#allocation2 + $0x60] sm:$0xff]  ;;  %v81_v43 = vld [vmem:[#allocation2 + $0x68] sm:$0xff]  ;;  %v82_v45 = vld [vmem:[#allocation2 + $0x70] sm:$0xff]  ;;  %v984_v24 = vsub.s32 0, %v1824_v19  ;;  %v1040_v30 = vmul.f32 %v1711_v11, %v1711_v11  ;;  %v988_v31 = vsub.s32 1, %v1824_v19  ;;  %v1039_v32 = vmul.f32 %v1707_v10, %v1707_v10 }
  0x31   :  { %1437 = vmatmul.mubr.msk.f32.gmra.mrb[2].mxu0 %vm102_vm0, %v1721_v16  ;;  %v1781_v41 = vsub.f32 %v64_v38, %v80_v39  ;;  %v1791_v46 = vsub.f32 %v65_v42, %v81_v43  ;;  %v1795_v47 = vsub.f32 %v66_v44, %v82_v45  ;;  %v67_v48 = vld [vmem:[%s2133_s0 + $0x78] sm:$0xff]  ;;  %v296_v51 = vld [vmem:[#allocation5] sm:$0xff]  ;;  %v297_v57 = vld [vmem:[#allocation5 + $0x8] sm:$0xff]  ;;  %v970_v21 = vand.u32 1, %v958_v20  ;;  %s1609_s0 = scalar_lea.hbm %s2139_s6, 16 }
  0x32   :  { %1439 = vmatprep.mubr.msk.f32.mxu0 %vm102_vm0, %v1725_v17  ;;  %v83_v49 = vld [vmem:[#allocation2 + $0x78] sm:$0xff]  ;;  %1461 = vmatprep.mubr.msk.f32.mxu1 %vm102_vm0, %v296_v51  ;;  %v1041_v33 = vmul.f32 %v1721_v16, %v1721_v16  ;;  %v1132_v36 = vsel %vm102_vm0, %v1038_v27, 0.0  ;;  %v1133_v37 = vsel %vm102_vm0, %v1040_v30, 0.0  ;;  %v1147_v39 = vsel %vm102_vm0, %v1039_v32, 0.0  ;;  %p1610_p2 = scmp.ne.s32.totalorder %s2139_s6, %s1609_s0  ;;  %p1613_p3 = scmp.lt.u32.totalorder %s1609_s0, %s2139_s6 }
  0x33   :  { %v1802_v50 = vsub.f32 %v67_v48, %v83_v49  ;;  %vm978_vm1 = vcmp.eq.s32.totalorder %v970_v21, 0  ;;  %v1042_v43 = vmul.f32 %v1725_v17, %v1725_v17  ;;  %v992_v45 = vsub.s32 2, %v1824_v19 }
  0x34   :  { %v1828_v26 = vsel %vm978_vm1, 1.0, %v1629_v25  ;;  %v1148_v42 = vsel %vm102_vm0, %v1041_v33, 0.0  ;;  %v1048_v18 = vmul.f32 %v1767_v35, %v1767_v35  ;;  %p1615_p4 = pnand %p1613_p3, %p1610_p2 }
  0x35   :  { %1440 = vmatmul.mubr.msk.f32.gmra.mrb[4].mxu0 %vm102_vm0, %v1735_v22  ;;  %v1842_v38 = vrot.slane %v1828_v26, %v984_v24  ;;  %v1849_v44 = vrot.slane %v1828_v26, %v988_v31  ;;  %v1004_v31 = vsub.s32 5, %v1824_v19 }
  0x36   :  { %1442 = vmatprep.mubr.msk.f32.mxu0 %vm102_vm0, %v1739_v23 }
  0x37   :  { %v1162_v48 = vmul.f32 %v1038_v27, %v1842_v38  ;;  %v1163_v49 = vmul.f32 %v1039_v32, %v1842_v38 }
  0x39   :  { %1443 = vmatmul.mubr.msk.f32.gmra.mrb[6].mxu0 %vm102_vm0, %v1749_v28 }
  0x3a   :  { %1445 = vmatprep.mubr.msk.f32.mxu0 %vm102_vm0, %v1753_v29 }
  0x3d   :  { %1446 = vmatmul.mubr.msk.f32.gmra.mrb[8].mxu0 %vm102_vm0, %v1763_v34 }
  0x3e   :  { %1448 = vmatprep.mubr.msk.f32.mxu0 %vm102_vm0, %v1767_v35 }
  0x41   :  { %1449 = vmatmul.mubr.msk.f32.gmra.mrb[10].mxu0 %vm102_vm0, %v1777_v40 }
  0x42   :  { %1451 = vmatprep.mubr.msk.f32.mxu0 %vm102_vm0, %v1781_v41 }
  0x45   :  { %1452 = vmatmul.mubr.msk.f32.gmra.mrb[12].mxu0 %vm102_vm0, %v1791_v46 }
  0x46   :  { %1454 = vmatprep.mubr.msk.f32.mxu0 %vm102_vm0, %v1795_v47 }
  0x49   :  { %1455 = vmatmul.mubr.msk.f32.gmra.mrb[14].mxu0 %vm102_vm0, %v1802_v50 }
 0x100   :  { %v1435_v52 = vpop.f32.mrb[0].mxu0 }
 0x101   :  { %v217_v53 = vpop.f32.mrb[1].mxu0 }
 0x102   :  { %v1517_v54 = vpack.c.bf16 %v1435_v52, %v217_v53  ;;  %v1043_v52 = vmul.f32 %v1735_v22, %v1735_v22  ;;  %v1149_v53 = vadd.f32 %v1148_v42, %v1147_v39  ;;  %v1008_v39 = vsub.s32 6, %v1824_v19 }
 0x103   :  { %v1012_v42 = vsub.s32 7, %v1824_v19 }
 0x104   :  { %v1438_v55 = vpop.f32.mrb[2].mxu0  ;;  %1518 = vmatprep.subr.bf16.mxu1 %v1517_v54 }
 0x105   :  { %v227_v56 = vpop.f32.mrb[3].mxu0  ;;  %1520 = vmatpush3.bf16.msra.mxu1 %v1517_v54  ;;  %v1135_v54 = vsel %vm102_vm0, %v1042_v43, 0.0 }
 0x106   :  { %v1521_v58 = vpack.c.bf16 %v1438_v55, %v227_v56  ;;  %v1164_v55 = vmul.f32 %v1040_v30, %v1849_v44  ;;  %v1150_v56 = vsel %vm102_vm0, %v1043_v52, 0.0 }
 0x108   :  { %v1441_v59 = vpop.f32.mrb[4].mxu0  ;;  %1462 = vmatmul.mubr.msk.f32.vlgmr.msra.gmra.mrb[0].mxu1 %vm102_vm0, %v297_v57  ;;  %1522 = vmatprep.subr.bf16.mxu1 %v1521_v58 }
 0x109   :  { %v237_v60 = vpop.f32.mrb[5].mxu0  ;;  %1524 = vmatpush3.bf16.msra.mxu1 %v1521_v58  ;;  %1468 = vmatprep.mubr.msk.f32.mxu1 %vm102_vm0, %v296_v51  ;;  %v1044_v58 = vmul.f32 %v1739_v23, %v1739_v23 }
 0x10a   :  { %v1525_v61 = vpack.c.bf16 %v1441_v59, %v237_v60  ;;  %v1863_v59 = vrot.slane %v1828_v26, %v992_v45  ;;  %v996_v60 = vsub.s32 3, %v1824_v19  ;;  %v907_v45 = vld [vmem:[%s2135_s2 + $0x18] sm:$0xff] }
 0x10c   :  { %v1444_v62 = vpop.f32.mrb[6].mxu0  ;;  %1469 = vmatmul.mubr.msk.f32.vlgmr.msra.gmra.mrb[2].mxu1 %vm102_vm0, %v297_v57  ;;  %1526 = vmatprep.subr.bf16.mxu1 %v1525_v61 }
 0x10d   :  { %v247_v63 = vpop.f32.mrb[7].mxu0  ;;  %1528 = vmatpush3.bf16.msra.mxu1 %v1525_v61  ;;  %1475 = vmatprep.mubr.msk.f32.mxu1 %vm102_vm0, %v296_v51  ;;  %v1178_v61 = vsel %vm102_vm0, %v1162_v48, 0.0 }
 0x10e   :  { %v1529_v0 = vpack.c.bf16 %v1444_v62, %v247_v63  ;;  %v1193_v62 = vsel %vm102_vm0, %v1163_v49, 0.0  ;;  %v1050_v49 = vmul.f32 %v1781_v41, %v1781_v41 }
 0x110   :  { %v1447_v1 = vpop.f32.mrb[8].mxu0  ;;  %1476 = vmatmul.mubr.msk.f32.vlgmr.msra.gmra.mrb[4].mxu1 %vm102_vm0, %v297_v57  ;;  %1530 = vmatprep.subr.bf16.mxu1 %v1529_v0 }
 0x111   :  { %v257_v2 = vpop.f32.mrb[9].mxu0  ;;  %1532 = vmatpush3.bf16.msra.mxu1 %v1529_v0  ;;  %1482 = vmatprep.mubr.msk.f32.mxu1 %vm102_vm0, %v296_v51  ;;  %v1045_v0 = vmul.f32 %v1749_v28, %v1749_v28 }
 0x112   :  { %v1533_v3 = vpack.c.bf16 %v1447_v1, %v257_v2  ;;  %v1151_v1 = vadd.f32 %v1150_v56, %v1149_v53  ;;  %v1137_v2 = vsel %vm102_vm0, %v1044_v58, 0.0 }
 0x114   :  { %v1450_v4 = vpop.f32.mrb[10].mxu0  ;;  %1483 = vmatmul.mubr.msk.f32.vlgmr.msra.gmra.mrb[6].mxu1 %vm102_vm0, %v297_v57  ;;  %1534 = vmatprep.subr.bf16.mxu1 %v1533_v3 }
 0x115   :  { %v267_v5 = vpop.f32.mrb[11].mxu0  ;;  %1536 = vmatpush3.bf16.msra.mxu1 %v1533_v3  ;;  %1489 = vmatprep.mubr.msk.f32.mxu1 %vm102_vm0, %v296_v51  ;;  %v1166_v3 = vmul.f32 %v1042_v43, %v1863_v59  ;;  %v905_v43 = vld [vmem:[%s2135_s2 + $0x8] sm:$0xff] }
 0x116   :  { %v1537_v6 = vpack.c.bf16 %v1450_v4, %v267_v5  ;;  %v1179_v4 = vsel %vm102_vm0, %v1164_v55, 0.0  ;;  %v1152_v5 = vsel %vm102_vm0, %v1045_v0, 0.0 }
 0x117   :  { %v1180_v20 = vadd.f32 %v1179_v4, %v1178_v61  ;;  %v1153_v21 = vadd.f32 %v1152_v5, %v1151_v1  ;;  %v1181_v25 = vsel %vm102_vm0, %v1166_v3, 0.0  ;;  %v1922_v61 = vmul.f32 2.6916505e-06, %v907_v45  ;;  %v913_v3 = vld [vmem:[%s2136_s3 + $0x8] sm:$0xff]  ;;  %v915_v4 = vld [vmem:[%s2136_s3 + $0x18] sm:$0xff] }
 0x118   :  { %v1453_v8 = vpop.f32.mrb[12].mxu0  ;;  %1490 = vmatmul.mubr.msk.f32.vlgmr.msra.gmra.mrb[8].mxu1 %vm102_vm0, %v297_v57  ;;  %1538 = vmatprep.subr.bf16.mxu1 %v1537_v6 }
 0x119   :  { %v277_v9 = vpop.f32.mrb[13].mxu0  ;;  %1540 = vmatpush3.bf16.msra.mxu1 %v1537_v6  ;;  %1496 = vmatprep.mubr.msk.f32.mxu1 %vm102_vm0, %v296_v51  ;;  %v1167_v6 = vmul.f32 %v1043_v52, %v1863_v59  ;;  %v1182_v53 = vadd.f32 %v1181_v25, %v1180_v20 }
 0x11a   :  { %v1541_v12 = vpack.c.bf16 %v1453_v8, %v277_v9  ;;  %v1000_v8 = vsub.s32 4, %v1824_v19  ;;  %v906_v19 = vld [vmem:[%s2135_s2 + $0x10] sm:$0xff] }
 0x11c   :  { %v1456_v13 = vpop.f32.mrb[14].mxu0  ;;  %1497 = vmatmul.mubr.msk.f32.vlgmr.msra.gmra.mrb[10].mxu1 %vm102_vm0, %v297_v57  ;;  %1542 = vmatprep.subr.bf16.mxu1 %v1541_v12  ;;  %v1889_v30 = vrot.slane %v1828_v26, %v1000_v8 }
 0x11d   :  { %v287_v14 = vpop.f32.mrb[15].mxu0  ;;  %1544 = vmatpush3.bf16.msra.mxu1 %v1541_v12  ;;  %1503 = vmatprep.mubr.msk.f32.mxu1 %vm102_vm0, %v296_v51  ;;  %v1046_v12 = vmul.f32 %v1753_v29, %v1753_v29 }
 0x11e   :  { %v1545_v15 = vpack.c.bf16 %v1456_v13, %v287_v14  ;;  %v1880_v13 = vrot.slane %v1828_v26, %v996_v60  ;;  %v909_v60 = vmul.f32 2.6916505e-06, %v905_v43  ;;  %v1141_v43 = vsel %vm102_vm0, %v1048_v18, 0.0 }
 0x11f   :  { %v1170_v52 = vmul.f32 %v1046_v12, %v1889_v30 }
 0x120   :  { %1504 = vmatmul.mubr.msk.f32.vlgmr.msra.gmra.mrb[12].mxu1 %vm102_vm0, %v297_v57  ;;  %1546 = vmatprep.subr.bf16.mxu1 %v1545_v15  ;;  %v1168_v24 = vmul.f32 %v1044_v58, %v1880_v13  ;;  %v1169_v32 = vmul.f32 %v1045_v0, %v1880_v13  ;;  %v1920_v58 = vrot.slane %v1828_v26, %v1004_v31  ;;  %v923_v25 = vsel %vm102_vm0, %v909_v60, 0.0 }
 0x121   :  { %1548 = vmatpush3.bf16.msra.mxu1 %v1545_v15  ;;  %1510 = vmatprep.mubr.msk.f32.mxu1 %vm102_vm0, %v296_v51  ;;  %v1134_v51 = vadd.f32 %v1133_v37, %v1132_v36  ;;  %v1047_v15 = vmul.f32 %v1763_v34, %v1763_v34  ;;  %v1139_v36 = vsel %vm102_vm0, %v1046_v12, 0.0  ;;  %v1049_v37 = vmul.f32 %v1777_v40, %v1777_v40 }
 0x122   :  { %v1183_v56 = vsel %vm102_vm0, %v1168_v24, 0.0  ;;  %v1929_v0 = vrot.slane %v1828_v26, %v1012_v42  ;;  %v1172_v5 = vmul.f32 %v1048_v18, %v1920_v58  ;;  %v1052_v31 = vmul.f32 %v1795_v47, %v1795_v47 }
 0x123   :  { %v1136_v63 = vadd.f32 %v1135_v54, %v1134_v51  ;;  %v1154_v48 = vsel %vm102_vm0, %v1047_v15, 0.0  ;;  %v904_v51 = vld [vmem:[%s2135_s2] sm:$0xff]  ;;  %v1051_v54 = vmul.f32 %v1791_v46, %v1791_v46  ;;  %v1171_v55 = vmul.f32 %v1047_v15, %v1889_v30 }
 0x124   :  { %1511 = vmatmul.mubr.msk.f32.vlgmr.msra.gmra.mrb[14].mxu1 %vm102_vm0, %v297_v57  ;;  %v1165_v57 = vmul.f32 %v1041_v33, %v1849_v44  ;;  %v1196_v33 = vsel %vm102_vm0, %v1167_v6, 0.0  ;;  %v908_v1 = vmul.f32 2.6916505e-06, %v904_v51  ;;  %v1173_v6 = vmul.f32 %v1049_v37, %v1920_v58 }
 0x125   :  { %v1138_v14 = vadd.f32 %v1137_v2, %v1136_v63  ;;  %v1926_v63 = vrot.slane %v1828_v26, %v1008_v39  ;;  %v910_v2 = vmul.f32 2.6916505e-06, %v906_v19  ;;  %v1184_v8 = vadd.f32 %v1183_v56, %v1182_v53  ;;  %v912_v26 = vld [vmem:[%s2136_s3] sm:$0xff] }
 0x126   :  { %v1194_v9 = vsel %vm102_vm0, %v1165_v57, 0.0  ;;  %v1155_v15 = vadd.f32 %v1154_v48, %v1153_v21  ;;  %v1200_v24 = vsel %vm102_vm0, %v1171_v55, 0.0  ;;  %v917_v21 = vmul.f32 -0.00064086914, %v913_v3 }
 0x127   :  { %v1195_v27 = vadd.f32 %v1194_v9, %v1193_v62  ;;  %v1198_v62 = vsel %vm102_vm0, %v1169_v32, 0.0  ;;  %v1185_v9 = vsel %vm102_vm0, %v1170_v52, 0.0  ;;  %v1140_v12 = vadd.f32 %v1139_v36, %v1138_v14  ;;  %v914_v14 = vld [vmem:[%s2136_s3 + $0x10] sm:$0xff] }
 0x128   :  { %v1053_v32 = vmul.f32 %v1802_v50, %v1802_v50  ;;  %v921_v39 = vsel %vm102_vm0, %v910_v2, 0.0  ;;  %v919_v36 = vmul.f32 -0.00064086914, %v915_v4  ;;  %v916_v42 = vmul.f32 -0.00064086914, %v912_v26 }
 0x129   :  { %v1197_v57 = vadd.f32 %v1196_v33, %v1195_v27  ;;  %v924_v27 = vsel %vm102_vm0, %v1922_v61, 0.0  ;;  %v920_v33 = vsel %vm102_vm0, %v908_v1, 0.0  ;;  %v1156_v45 = vsel %vm102_vm0, %v1049_v37, 0.0 }
 0x12a   :  { %v1186_v48 = vadd.f32 %v1185_v9, %v1184_v8  ;;  %v1958_v51 = vadd.f32 %v924_v27, %v923_v25  ;;  %v1174_v19 = vmul.f32 %v1050_v49, %v1926_v63  ;;  %v1187_v52 = vsel %vm102_vm0, %v1172_v5, 0.0 }
 0x12b   :  { %v1199_v20 = vadd.f32 %v1198_v62, %v1197_v57  ;;  %v1962_v55 = vadd.f32 %v921_v39, %v920_v33  ;;  %v918_v56 = vmul.f32 -0.00064086914, %v914_v14  ;;  %v1175_v57 = vmul.f32 %v1051_v54, %v1926_v63 }
 0x12c   :  { %v1202_v62 = vsel %vm102_vm0, %v1173_v6, 0.0  ;;  %v929_v3 = vsel %vm102_vm0, %v917_v21, 0.0  ;;  %v930_v18 = vsel %vm102_vm0, %v919_v36, 0.0  ;;  %v1142_v37 = vadd.f32 %v1141_v43, %v1140_v12 }
 0x12d   :  { %v1201_v53 = vadd.f32 %v1200_v24, %v1199_v20  ;;  %v1157_v4 = vadd.f32 %v1156_v45, %v1155_v15  ;;  %v942_v8 = vmul.f32 %v916_v42, %v916_v42  ;;  %v1143_v9 = vsel %vm102_vm0, %v1050_v49, 0.0 }
 0x12e   :  { %v1158_v26 = vsel %vm102_vm0, %v1051_v54, 0.0  ;;  %v1188_v5 = vadd.f32 %v1187_v52, %v1186_v48  ;;  %v943_v20 = vmul.f32 %v917_v21, %v917_v21  ;;  %v1176_v24 = vmul.f32 %v1052_v31, %v1929_v0 }
 0x12f   :  { %v1189_v25 = vsel %vm102_vm0, %v1174_v19, 0.0  ;;  %v1203_v27 = vadd.f32 %v1202_v62, %v1201_v53  ;;  %v944_v33 = vmul.f32 %v918_v56, %v918_v56  ;;  %v945_v6 = vmul.f32 %v919_v36, %v919_v36 }
 0x130   :  { %v1177_v39 = vmul.f32 %v1053_v32, %v1929_v0  ;;  %v1204_v14 = vsel %vm102_vm0, %v1175_v57, 0.0  ;;  %v1144_v12 = vadd.f32 %v1143_v9, %v1142_v37  ;;  %v1145_v15 = vsel %vm102_vm0, %v1052_v31, 0.0 }
 0x131   :  { %v1159_v43 = vadd.f32 %v1158_v26, %v1157_v4  ;;  %v1160_v49 = vsel %vm102_vm0, %v1053_v32, 0.0  ;;  %v1190_v54 = vadd.f32 %v1189_v25, %v1188_v5  ;;  %v932_v45 = vmul.f32 %v908_v1, %v908_v1 }
 0x132   :  { %v933_v21 = vmul.f32 %v909_v60, %v909_v60  ;;  %v934_v48 = vmul.f32 %v910_v2, %v910_v2  ;;  %v1977_v52 = vsel %vm102_vm0, %v916_v42, 0.0  ;;  %v1191_v19 = vsel %vm102_vm0, %v1176_v24, 0.0 }
 0x133   :  { %v1205_v36 = vadd.f32 %v1204_v14, %v1203_v27  ;;  %v935_v53 = vmul.f32 %v1922_v61, %v1922_v61  ;;  %v1982_v57 = vadd.f32 %v930_v18, %v929_v3  ;;  %v946_v31 = vsel %vm102_vm0, %v942_v8, 0.0 }
 0x134   :  { %v949_v62 = vsel %vm102_vm0, %v943_v20, 0.0  ;;  %v1206_v32 = vsel %vm102_vm0, %v1177_v39, 0.0  ;;  %v947_v60 = vsel %vm102_vm0, %v944_v33, 0.0  ;;  %v950_v1 = vsel %vm102_vm0, %v945_v6, 0.0 }
 0x135   :  { %v1989_v2 = vadd.f32 %v1145_v15, %v1144_v12  ;;  %v1991_v42 = vadd.f32 %v1160_v49, %v1159_v43  ;;  %v1993_v4 = vadd.f32 %v1191_v19, %v1190_v54  ;;  %v936_v61 = vsel %vm102_vm0, %v932_v45, 0.0 }
 0x136   :  { %v937_v3 = vsel %vm102_vm0, %v934_v48, 0.0  ;;  %v939_v18 = vsel %vm102_vm0, %v933_v21, 0.0  ;;  %v1999_v5 = vadd.f32 %v1206_v32, %v1205_v36  ;;  %v940_v20 = vsel %vm102_vm0, %v935_v53, 0.0 }
 0x137   :  { %v2004_v27 = vsel %vm102_vm0, %v918_v56, 0.0  ;;  %v2006_v33 = vadd.f32 %v947_v60, %v946_v31  ;;  %v2010_v14 = vadd.f32 %v950_v1, %v949_v62  ;;  %v2018_v56 = vadd.f32 %v940_v20, %v939_v18 }
 0x138   :  { %v1209_v48 = vsub.f32 %v1991_v42, %v1999_v5 }
 0x1db   :  { %v1463_v37 = vpop.f32.mrb[0].mxu1 }
 0x1dc   :  { %v1023_v8 = vmul.f32 %v1463_v37, %v1707_v10  ;;  %v1211_v9 = vmul.f32 %v1463_v37, %v1463_v37  ;;  %v370_v26 = vpop.f32.mrb[1].mxu1  ;;  %v2012_v10 = vadd.f32 %v937_v3, %v936_v61 }
 0x1dd   :  { %v1022_v24 = vmul.f32 %v370_v26, %v1702_v7  ;;  %v1210_v25 = vmul.f32 %v370_v26, %v370_v26  ;;  %v1208_v7 = vsub.f32 %v1989_v2, %v1993_v4  ;;  %v1314_v2 = vmul.f32 %v1209_v48, %v2010_v14 }
 0x1de   :  { %v1085_v6 = vmul.f32 %v1023_v8, %v1842_v38  ;;  %v1227_v39 = vsel %vm102_vm0, %v1211_v9, 0.0  ;;  %v1069_v49 = vsel %vm102_vm0, %v1023_v8, 0.0 }
 0x1df   :  { %v1084_v12 = vmul.f32 %v1022_v24, %v1842_v38  ;;  %v1226_v15 = vsel %vm102_vm0, %v1210_v25, 0.0  ;;  %v1470_v43 = vpop.f32.mrb[2].mxu1  ;;  %v1054_v19 = vsel %vm102_vm0, %v1022_v24, 0.0  ;;  %v1316_v42 = vsel %vm102_vm0, %v1314_v2, 0.0 }
 0x1e0   :  { %v1228_v54 = vadd.f32 %v1227_v39, %v1226_v15  ;;  %v1025_v45 = vmul.f32 %v1470_v43, %v1721_v16  ;;  %v445_v21 = vpop.f32.mrb[3].mxu1  ;;  %v1213_v38 = vmul.f32 %v1470_v43, %v1470_v43  ;;  %v1115_v31 = vsel %vm102_vm0, %v1085_v6, 0.0 }
 0x1e1   :  { %v1024_v36 = vmul.f32 %v445_v21, %v1711_v11  ;;  %v1212_v53 = vmul.f32 %v445_v21, %v445_v21  ;;  %v1100_v62 = vsel %vm102_vm0, %v1084_v12, 0.0 }
 0x1e2   :  { %v1070_v32 = vsel %vm102_vm0, %v1025_v45, 0.0  ;;  %v1087_v60 = vmul.f32 %v1025_v45, %v1849_v44  ;;  %v1231_v24 = vsel %vm102_vm0, %v1213_v38, 0.0 }
 0x1e3   :  { %v1071_v1 = vadd.f32 %v1070_v32, %v1069_v49  ;;  %v1055_v16 = vsel %vm102_vm0, %v1024_v36, 0.0  ;;  %v1086_v37 = vmul.f32 %v1024_v36, %v1849_v44  ;;  %v1229_v61 = vsel %vm102_vm0, %v1212_v53, 0.0  ;;  %v1477_v3 = vpop.f32.mrb[4].mxu1 }
 0x1e4   :  { %v1116_v18 = vsel %vm102_vm0, %v1087_v60, 0.0  ;;  %v1056_v11 = vadd.f32 %v1055_v16, %v1054_v19  ;;  %v1230_v8 = vadd.f32 %v1229_v61, %v1228_v54  ;;  %v1027_v9 = vmul.f32 %v1477_v3, %v1735_v22  ;;  %v520_v26 = vpop.f32.mrb[5].mxu1 }
 0x1e5   :  { %v1117_v20 = vadd.f32 %v1116_v18, %v1115_v31  ;;  %v1101_v25 = vsel %vm102_vm0, %v1086_v37, 0.0  ;;  %v1026_v6 = vmul.f32 %v520_v26, %v1725_v17  ;;  %v1214_v15 = vmul.f32 %v520_v26, %v520_v26 }
 0x1e6   :  { %v1102_v39 = vadd.f32 %v1101_v25, %v1100_v62  ;;  %v1072_v44 = vsel %vm102_vm0, %v1027_v9, 0.0  ;;  %v1089_v12 = vmul.f32 %v1027_v9, %v1863_v59  ;;  %v1215_v49 = vmul.f32 %v1477_v3, %v1477_v3 }
 0x1e7   :  { %v1073_v43 = vadd.f32 %v1072_v44, %v1071_v1  ;;  %v1057_v54 = vsel %vm102_vm0, %v1026_v6, 0.0  ;;  %v1088_v22 = vmul.f32 %v1026_v6, %v1863_v59  ;;  %v1484_v45 = vpop.f32.mrb[6].mxu1  ;;  %v1232_v38 = vadd.f32 %v1231_v24, %v1230_v8 }
 0x1e8   :  { %v1118_v21 = vsel %vm102_vm0, %v1089_v12, 0.0  ;;  %v1058_v19 = vadd.f32 %v1057_v54, %v1056_v11  ;;  %v1233_v36 = vsel %vm102_vm0, %v1214_v15, 0.0  ;;  %v595_v17 = vpop.f32.mrb[7].mxu1  ;;  %v1029_v62 = vmul.f32 %v1484_v45, %v1749_v28 }
 0x1e9   :  { %v1119_v53 = vadd.f32 %v1118_v21, %v1117_v20  ;;  %v1103_v31 = vsel %vm102_vm0, %v1088_v22, 0.0  ;;  %v1217_v32 = vmul.f32 %v1484_v45, %v1484_v45  ;;  %v1234_v1 = vadd.f32 %v1233_v36, %v1232_v38 }
 0x1ea   :  { %v1104_v60 = vadd.f32 %v1103_v31, %v1102_v39  ;;  %v1028_v16 = vmul.f32 %v595_v17, %v1739_v23  ;;  %v1216_v37 = vmul.f32 %v595_v17, %v595_v17  ;;  %v1235_v59 = vsel %vm102_vm0, %v1215_v49, 0.0 }
 0x1eb   :  { %v1074_v61 = vsel %vm102_vm0, %v1029_v62, 0.0  ;;  %v1091_v3 = vmul.f32 %v1029_v62, %v1880_v13  ;;  %v1239_v18 = vsel %vm102_vm0, %v1217_v32, 0.0  ;;  %v1491_v11 = vpop.f32.mrb[8].mxu1  ;;  %v1236_v26 = vadd.f32 %v1235_v59, %v1234_v1 }
 0x1ec   :  { %v1075_v8 = vadd.f32 %v1074_v61, %v1073_v43  ;;  %v1059_v9 = vsel %vm102_vm0, %v1028_v16, 0.0  ;;  %v1090_v28 = vmul.f32 %v1028_v16, %v1880_v13  ;;  %v670_v20 = vpop.f32.mrb[9].mxu1  ;;  %v1237_v25 = vsel %vm102_vm0, %v1216_v37, 0.0 }
 0x1ed   :  { %v1120_v24 = vsel %vm102_vm0, %v1091_v3, 0.0  ;;  %v1060_v23 = vadd.f32 %v1059_v9, %v1058_v19  ;;  %v1031_v6 = vmul.f32 %v1491_v11, %v1763_v34  ;;  %v1238_v12 = vadd.f32 %v1237_v25, %v1236_v26 }
 0x1ee   :  { %v1121_v39 = vadd.f32 %v1120_v24, %v1119_v53  ;;  %v1105_v44 = vsel %vm102_vm0, %v1090_v28, 0.0  ;;  %v1219_v15 = vmul.f32 %v1491_v11, %v1491_v11  ;;  %v1030_v13 = vmul.f32 %v670_v20, %v1753_v29 }
 0x1ef   :  { %v1106_v49 = vadd.f32 %v1105_v44, %v1104_v60  ;;  %v1076_v43 = vsel %vm102_vm0, %v1031_v6, 0.0  ;;  %v1093_v54 = vmul.f32 %v1031_v6, %v1889_v30  ;;  %v1498_v22 = vpop.f32.mrb[10].mxu1  ;;  %v1218_v19 = vmul.f32 %v670_v20, %v670_v20 }
 0x1f0   :  { %v1077_v45 = vadd.f32 %v1076_v43, %v1075_v8  ;;  %v1243_v21 = vsel %vm102_vm0, %v1219_v15, 0.0  ;;  %v1240_v38 = vadd.f32 %v1239_v18, %v1238_v12  ;;  %v745_v36 = vpop.f32.mrb[11].mxu1  ;;  %v1061_v17 = vsel %vm102_vm0, %v1030_v13, 0.0 }
 0x1f1   :  { %v1122_v34 = vsel %vm102_vm0, %v1093_v54, 0.0  ;;  %v1092_v53 = vmul.f32 %v1030_v13, %v1889_v30  ;;  %v1033_v31 = vmul.f32 %v1498_v22, %v1777_v40  ;;  %v1062_v32 = vadd.f32 %v1061_v17, %v1060_v23 }
 0x1f2   :  { %v1123_v62 = vadd.f32 %v1122_v34, %v1121_v39  ;;  %v1241_v60 = vsel %vm102_vm0, %v1218_v19, 0.0  ;;  %v1221_v29 = vmul.f32 %v1498_v22, %v1498_v22  ;;  %v1032_v30 = vmul.f32 %v745_v36, %v1767_v35 }
 0x1f3   :  { %v1107_v1 = vsel %vm102_vm0, %v1092_v53, 0.0  ;;  %v1242_v16 = vadd.f32 %v1241_v60, %v1240_v38  ;;  %v1078_v37 = vsel %vm102_vm0, %v1033_v31, 0.0  ;;  %v1095_v59 = vmul.f32 %v1033_v31, %v1920_v58  ;;  %v1505_v61 = vpop.f32.mrb[12].mxu1 }
 0x1f4   :  { %v1108_v3 = vadd.f32 %v1107_v1, %v1106_v49  ;;  %v1079_v18 = vadd.f32 %v1078_v37, %v1077_v45  ;;  %v1247_v11 = vsel %vm102_vm0, %v1221_v29, 0.0  ;;  %v820_v40 = vpop.f32.mrb[13].mxu1  ;;  %v1220_v9 = vmul.f32 %v745_v36, %v745_v36 }
 0x1f5   :  { %v1124_v8 = vsel %vm102_vm0, %v1095_v59, 0.0  ;;  %v1244_v28 = vadd.f32 %v1243_v21, %v1242_v16  ;;  %v1035_v26 = vmul.f32 %v1505_v61, %v1791_v46  ;;  %v1063_v24 = vsel %vm102_vm0, %v1032_v30, 0.0 }
 0x1f6   :  { %v1125_v20 = vadd.f32 %v1124_v8, %v1123_v62  ;;  %v1094_v23 = vmul.f32 %v1032_v30, %v1920_v58  ;;  %v1223_v25 = vmul.f32 %v1505_v61, %v1505_v61  ;;  %v1064_v6 = vadd.f32 %v1063_v24, %v1062_v32 }
 0x1f7   :  { %v1245_v39 = vsel %vm102_vm0, %v1220_v9, 0.0  ;;  %v1080_v44 = vsel %vm102_vm0, %v1035_v26, 0.0  ;;  %v1097_v35 = vmul.f32 %v1035_v26, %v1926_v63  ;;  %v1512_v12 = vpop.f32.mrb[14].mxu1  ;;  %v1034_v58 = vmul.f32 %v820_v40, %v1781_v41 }
 0x1f8   :  { %v1109_v15 = vsel %vm102_vm0, %v1094_v23, 0.0  ;;  %v1246_v49 = vadd.f32 %v1245_v39, %v1244_v28  ;;  %v1081_v43 = vadd.f32 %v1080_v44, %v1079_v18  ;;  %v1251_v46 = vsel %vm102_vm0, %v1223_v25, 0.0  ;;  %v895_v54 = vpop.f32.mrb[15].mxu1 }
 0x1f9   :  { %v1110_v13 = vadd.f32 %v1109_v15, %v1108_v3  ;;  %v1126_v22 = vsel %vm102_vm0, %v1097_v35, 0.0  ;;  %v1222_v45 = vmul.f32 %v820_v40, %v820_v40  ;;  %v1037_v38 = vmul.f32 %v1512_v12, %v1802_v50 }
 0x1fa   :  { %v1127_v21 = vadd.f32 %v1126_v22, %v1125_v20  ;;  %v1248_v19 = vadd.f32 %v1247_v11, %v1246_v49  ;;  %v1225_v36 = vmul.f32 %v1512_v12, %v1512_v12  ;;  %v1065_v34 = vsel %vm102_vm0, %v1034_v58, 0.0 }
 0x1fb   :  { %v1096_v17 = vmul.f32 %v1034_v58, %v1926_v63  ;;  %v1249_v53 = vsel %vm102_vm0, %v1222_v45, 0.0  ;;  %v1036_v31 = vmul.f32 %v895_v54, %v1795_v47  ;;  %v1066_v62 = vadd.f32 %v1065_v34, %v1064_v6 }
 0x1fc   :  { %v1250_v32 = vadd.f32 %v1249_v53, %v1248_v19  ;;  %v1082_v60 = vsel %vm102_vm0, %v1037_v38, 0.0  ;;  %v1099_v41 = vmul.f32 %v1037_v38, %v1929_v0  ;;  %v1224_v61 = vmul.f32 %v895_v54, %v895_v54 }
 0x1fd   :  { %v1111_v29 = vsel %vm102_vm0, %v1096_v17, 0.0  ;;  %v1083_v1 = vadd.f32 %v1082_v60, %v1081_v43  ;;  %v1067_v50 = vsel %vm102_vm0, %v1036_v31, 0.0  ;;  %v1098_v16 = vmul.f32 %v1036_v31, %v1929_v0 }
 0x1fe   :  { %v1112_v37 = vadd.f32 %v1111_v29, %v1110_v13  ;;  %v1128_v63 = vsel %vm102_vm0, %v1099_v41, 0.0  ;;  %v1068_v59 = vadd.f32 %v1067_v50, %v1066_v62  ;;  %v1252_v3 = vadd.f32 %v1251_v46, %v1250_v32 }
 0x1ff   :  { %v1113_v47 = vsel %vm102_vm0, %v1098_v16, 0.0  ;;  %v1129_v18 = vadd.f32 %v1128_v63, %v1127_v21  ;;  %v928_v11 = vadd.f32 %v2004_v27, %v1977_v52  ;;  %v1253_v40 = vsel %vm102_vm0, %v1224_v61, 0.0 }
 0x200   :  { %v1114_v30 = vadd.f32 %v1113_v47, %v1112_v37  ;;  %v1313_v0 = vmul.f32 %v1208_v7, %v2006_v33  ;;  %v1298_v8 = vmul.f32 %v1993_v4, %v2012_v10  ;;  %v1254_v9 = vadd.f32 %v1253_v40, %v1252_v3 }
 0x201   :  { %v1268_v28 = vmul.f32 %v1129_v18, %v1958_v51  ;;  %v1131_v26 = vsub.f32 %v1083_v1, %v1129_v18  ;;  %v1299_v20 = vmul.f32 %v1999_v5, %v2018_v56  ;;  %v1255_v52 = vsel %vm102_vm0, %v1225_v36, 0.0 }
 0x202   :  { %v1267_v27 = vmul.f32 %v1114_v30, %v1962_v55  ;;  %v1130_v24 = vsub.f32 %v1068_v59, %v1114_v30  ;;  %v1256_v33 = vadd.f32 %v1255_v52, %v1254_v9  ;;  %v1300_v55 = vsel %vm102_vm0, %v1298_v8, 0.0 }
 0x203   :  { %v1270_v4 = vsel %vm102_vm0, %v1268_v28, 0.0  ;;  %v1282_v10 = vmul.f32 %v1131_v26, %v1982_v57  ;;  %v1315_v6 = vsel %vm102_vm0, %v1313_v0, 0.0  ;;  %v1301_v5 = vsel %vm102_vm0, %v1299_v20, 0.0 }
 0x204   :  { %v1269_v51 = vsel %vm102_vm0, %v1267_v27, 0.0  ;;  %v1281_v7 = vmul.f32 %v1130_v24, %v928_v11  ;;  %1257 = vadd.xlane.f32.xlu0 %v1256_v33  ;;  %v1317_v57 = vadd.f32 %v1316_v42, %v1315_v6  ;;  %v1302_v48 = vadd.f32 %v1301_v5, %v1300_v55 }
 0x205   :  { %v1271_v56 = vadd.f32 %v1270_v4, %v1269_v51  ;;  %v1284_v23 = vsel %vm102_vm0, %v1282_v10, 0.0 }
 0x206   :  { %v1283_v25 = vsel %vm102_vm0, %v1281_v7, 0.0 }
 0x207   :  { %v1285_v14 = vadd.f32 %v1284_v23, %v1283_v25 }
 0x208   :  { %1272 = vadd.xlane.f32.xlu0 %v1271_v56 }
 0x209   :  { %1286 = vadd.xlane.f32.xlu1 %v1285_v14 }
 0x20c   :  { %1318 = vadd.xlane.f32.xlu0 %v1317_v57 }
 0x20d   :  { %1303 = vadd.xlane.f32.xlu1 %v1302_v48 }
 0x291   :  { %v1258_v39 = vpop.xlane.xlu0 %1257 }
 0x292   :  { %v1259_v44 = vrot.slane %v1258_v39, 4 }
 0x294   :  { %v1260_v35 = vadd.f32 %v1259_v44, %v1258_v39 }
 0x295   :  { %v1273_v12 = vpop.xlane.xlu0 %1272 }
 0x296   :  { %v1287_v15 = vpop.xlane.xlu1 %1286  ;;  %v1261_v49 = vrot.slane %v1260_v35, 2  ;;  %v1274_v43 = vrot.slane %v1273_v12, 4 }
 0x297   :  { %v1288_v46 = vrot.slane %v1287_v15, 4 }
 0x298   :  { %v1275_v54 = vadd.f32 %v1274_v43, %v1273_v12  ;;  %v1262_v22 = vadd.f32 %v1261_v49, %v1260_v35 }
 0x299   :  { %v1289_v13 = vadd.f32 %v1288_v46, %v1287_v15  ;;  %v1319_v58 = vpop.xlane.xlu0 %1318 }
 0x29a   :  { %v1304_v45 = vpop.xlane.xlu1 %1303  ;;  %v1276_v21 = vrot.slane %v1275_v54, 2  ;;  %v1320_v38 = vrot.slane %v1319_v58, 4  ;;  %v1263_v34 = vrot.slane %v1262_v22, 1 }
 0x29b   :  { %v1290_v19 = vrot.slane %v1289_v13, 2  ;;  %v1305_v36 = vrot.slane %v1304_v45, 4 }
 0x29c   :  { %v1321_v17 = vadd.f32 %v1320_v38, %v1319_v58  ;;  %v1277_v31 = vadd.f32 %v1276_v21, %v1275_v54  ;;  %v1264_v32 = vadd.f32 %v1263_v34, %v1262_v22 }
 0x29d   :  { %v1306_v53 = vadd.f32 %v1305_v36, %v1304_v45  ;;  %v1291_v62 = vadd.f32 %v1290_v19, %v1289_v13 }
 0x29e   :  { %v1322_v60 = vrot.slane %v1321_v17, 2  ;;  %v1278_v29 = vrot.slane %v1277_v31, 1  ;;  %1549 = vpush %v1264_v32 }
 0x29f   :  { %v1307_v41 = vrot.slane %v1306_v53, 2  ;;  %v1292_v1 = vrot.slane %v1291_v62, 1 }
 0x2a0   :  { %v1323_v50 = vadd.f32 %v1322_v60, %v1321_v17  ;;  %v1279_v37 = vadd.f32 %v1278_v29, %v1277_v31 }
 0x2a1   :  { %v1308_v16 = vadd.f32 %v1307_v41, %v1306_v53  ;;  %v1293_v63 = vadd.f32 %v1292_v1, %v1291_v62 }
 0x2a2   :  { %1551 = vpush %v1279_v37  ;;  %v1324_v61 = vrot.slane %v1323_v50, 1 }
 0x2a3   :  { %v1309_v59 = vrot.slane %v1308_v16, 1  ;;  %1553 = vpush %v1293_v63 }
 0x2a4   :  { %v1325_v3 = vadd.f32 %v1324_v61, %v1323_v50 }
 0x2a5   :  { %v1310_v47 = vadd.f32 %v1309_v59, %v1308_v16 }
 0x2a7   :  { %1555 = vpush %v1310_v47 }
 0x2a8   :  { %1557 = vpush %v1325_v3 }
 0x2cf   :  { %s1550_s3 = spop %1549 }
 0x2d0   :  { %s1266_s21 = smul.f32 2.0, %s1550_s3 }
 0x2d3   :  { %s1552_s19 = spop %1551 }
 0x2d4   :  { %s1554_s20 = spop %1553 }
 0x2d5   :  { %s1295_s1 = sadd.f32 %s1554_s20, %s1552_s19 }
 0x2d7   :  { %s1296_s22 = smul.f32 2.0, %s1295_s1 }
 0x2d8   :  { %s1556_s24 = spop %1555 }
 0x2d9   :  { %s1297_s23 = sadd.f32 %s1296_s22, %s1266_s21  ;;  %s1558_s26 = spop %1557 }
 0x2db   :  { %s1312_s25 = sadd.f32 %s1556_s24, %s1297_s23 }
 0x2dd   :  { %s1327_s27 = sadd.f32 %s1558_s26, %s1312_s25 }
 0x2df   :  { %s1328_s4 = smul.f32 0.00024414063, %s1327_s27 }
 0x2e1   :  { %1330 = sst [smem:[#allocation7]] %s1328_s4 }
 0x2e2   :  { %1618 = shalt.err (!%p1615_p4)
}
 0x2e3   :  { %s1630_s9 = smov [#allocation7]  }
 0x2e4   :  { %1338 = dma.smem_to_hbm %s1630_s9, 16, %s2139_s6, [#allocation4]  }
 0x2e5   :  { %1623 = dma.done.wait [#allocation4], 16  }
 0x2e6   :  { %1624 = vsyncadd [#allocation4], 4294967280 }
 0x2e7   :  { %1342 = sfence }
 0x2e8   :  { %1343 = vsyncpa [#allocation3], 1 }
 0x2e9   :  { %1344 = vsyncpa [#allocation6], 1 }
 0x2ea   :  { %1345 = vsyncpa [#allocation4], 1 }

</bundles_post_ra>
